<compile_context>
chip_gen: v7x
topology: tpu7x:2x2x1
jax: 0.10.0
libtpu: 0.0.40
codegen_flags: <defaults>
</compile_context>

<pallas_src>
import functools

import jax
import jax.numpy as jnp
from jax.experimental import pallas as pl
from jax.experimental.pallas import tpu as pltpu

IGNORE_INDEX = 255
LANES = 128
MAX_BLOCK_ROWS = 4096          # (4096,128) f32 = 2 MiB per input per grid step
INNER_ROWS = 1024              # compute strip inside a block (bounds VMEM temps)
VMEM_LIMIT_BYTES = 32 * 1024 * 1024


def _detect_num_tensorcores():
    """Best-effort TensorCore count (2 on v7x-class chips, else 1)."""
    try:
        info = pltpu.get_tpu_info()
    except Exception:
        return 1
    for name in ("num_tensorcores", "tensorcore_count", "tensorcores_per_chip",
                 "cores_per_chip", "num_cores_per_chip", "num_cores", "core_count"):
        v = getattr(info, name, None)
        if v is None:
            continue
        try:
            v = int(v)
        except (TypeError, ValueError):
            continue
        if v > 0:
            return min(v, 2)
    return 1


def _iou_loss_kernel(pred_ref, tgt_ref, num_ref, den_ref, *,
                     ignore_index, total_rows, total_blocks,
                     blocks_per_split, inner_rows,
                     needs_tail_mask, needs_replay_skip):
    c = pl.program_id(0)   # split axis ("parallel")
    i = pl.program_id(1)   # reduction axis ("arbitrary")

    # Zero the resident per-split accumulator blocks at the start of each split.
    @pl.when(i == 0)
    def _():
        num_ref[...] = jnp.zeros_like(num_ref)
        den_ref[...] = jnp.zeros_like(den_ref)

    block_rows, lanes = pred_ref.shape
    acc_rows = num_ref.shape[1]
    n_strips = block_rows // inner_rows
    gblock = c * blocks_per_split + i        # unclamped logical block index
    ign = jnp.float32(ignore_index)          # compare in f32 (exact for int/f32 labels)

    def accumulate(with_bound_mask):
        # Static strip loop: each strip's temporaries die at its ref-accumulate,
        # keeping VMEM temp pressure at (inner_rows,128) instead of the full block.
        for s in range(n_strips):
            r0 = s * inner_rows
            p = pred_ref[pl.ds(r0, inner_rows), :].astype(jnp.float32)
            t = tgt_ref[pl.ds(r0, inner_rows), :].astype(jnp.float32)
            valid = t != ign
            if with_bound_mask:
                # Only the (single) tail block pays for this: one sublane iota +
                # i32 add/compare masking rows read past the end of the slab.
                row = jax.lax.broadcasted_iota(jnp.int32, (inner_rows, lanes), 0)
                grow = gblock * block_rows + (r0 + row)
                valid = jnp.logical_and(valid, grow < total_rows)
            inter = jnp.where(valid, p * t, 0.0)           # o*t*m
            union = jnp.where(valid, p + t, 0.0) - inter   # o*m + t*m - o*t*m
            # Per-vreg accumulation: reshape is vreg-tile aligned, reduce over
            # axis 0 is plain VPU adds; cross-lane reduction happens in the wrapper.
            num_ref[...] += inter.reshape(-1, acc_rows, lanes).sum(axis=0, keepdims=True)
            den_ref[...] += union.reshape(-1, acc_rows, lanes).sum(axis=0, keepdims=True)

    if needs_tail_mask:
        # Steady-state blocks take the cheap unmasked path; only the last real
        # block masks its row overhang; replay blocks (gblock >= total_blocks,
        # from an uneven split) match neither condition and are skipped.
        @pl.when(gblock < total_blocks - 1)
        def _():
            accumulate(False)

        @pl.when(gblock == total_blocks - 1)
        def _():
            accumulate(True)
    elif needs_replay_skip:
        @pl.when(gblock < total_blocks)
        def _():
            accumulate(False)
    else:
        accumulate(False)


def iou_loss(outputs, targets, ignore_index=IGNORE_INDEX, *,
             max_block_rows=MAX_BLOCK_ROWS, num_splits=None):
    """1 - sum(o*t*m) / sum(o*m + t*m - o*t*m), m = (targets != ignore_index)."""
    assert outputs.shape == targets.shape
    n = int(outputs.size)

    p_flat = outputs.reshape(-1)   # free reshape (contiguous); native dtypes kept
    t_flat = targets.reshape(-1)

    n_main = (n // LANES) * LANES  # lane-aligned portion handled by the kernel
    rows = n_main // LANES
    assert rows < 2**31            # row-index math is int32 inside the kernel

    # Sub-128 ragged tail: tiny, summed in plain jnp (no jnp.pad copy of the slab).
    tail_num = jnp.float32(0.0)
    tail_den = jnp.float32(0.0)
    if n_main != n:
        p_tail = p_flat[n_main:].astype(jnp.float32)
        t_tail = t_flat[n_main:].astype(jnp.float32)
        m_tail = t_tail != jnp.float32(ignore_index)
        it = jnp.where(m_tail, p_tail * t_tail, 0.0)
        un = jnp.where(m_tail, p_tail + t_tail, 0.0) - it
        tail_num = it.sum()
        tail_den = un.sum()

    if rows == 0:
        return 1.0 - tail_num / tail_den

    if n_main != n:
        p2d = p_flat[:n_main].reshape(rows, LANES)
        t2d = t_flat[:n_main].reshape(rows, LANES)
    else:
        p2d = p_flat.reshape(rows, LANES)
        t2d = t_flat.reshape(rows, LANES)

    block_rows = max_block_rows if rows >= max_block_rows else rows
    inner_rows = INNER_ROWS if block_rows % INNER_ROWS == 0 else block_rows
    acc_rows = 8 if inner_rows % 8 == 0 else inner_rows

    total_blocks = pl.cdiv(rows, block_rows)
    if num_splits is None:
        num_splits = _detect_num_tensorcores()   # 1 on v5e/v6e: split axis is free
    num_splits = max(1, min(int(num_splits), total_blocks))
    blocks_per_split = pl.cdiv(total_blocks, num_splits)

    needs_tail_mask = (rows % block_rows) != 0
    needs_replay_skip = (total_blocks % num_splits) != 0

    def in_map(c, i):
        # Clamp so out-of-range logical blocks just re-read the last real block;
        # their contribution is skipped inside the kernel via pl.when.
        return (jnp.minimum(c * blocks_per_split + i, total_blocks - 1), 0)

    def out_map(c, i):
        return (c, 0, 0)

    kernel = functools.partial(
        _iou_loss_kernel,
        ignore_index=ignore_index,
        total_rows=rows,
        total_blocks=total_blocks,
        blocks_per_split=blocks_per_split,
        inner_rows=inner_rows,
        needs_tail_mask=needs_tail_mask,
        needs_replay_skip=needs_replay_skip,
    )

    num_part, den_part = pl.pallas_call(
        kernel,
        out_shape=(
            jax.ShapeDtypeStruct((num_splits, acc_rows, LANES), jnp.float32),
            jax.ShapeDtypeStruct((num_splits, acc_rows, LANES), jnp.float32),
        ),
        grid_spec=pltpu.PrefetchScalarGridSpec(
            num_scalar_prefetch=0,
            grid=(num_splits, blocks_per_split),
            in_specs=[
                pl.BlockSpec((block_rows, LANES), in_map),
                pl.BlockSpec((block_rows, LANES), in_map),
            ],
            out_specs=[
                pl.BlockSpec((1, acc_rows, LANES), out_map),
                pl.BlockSpec((1, acc_rows, LANES), out_map),
            ],
        ),
        compiler_params=pltpu.CompilerParams(
            dimension_semantics=("parallel", "arbitrary"),
            vmem_limit_bytes=VMEM_LIMIT_BYTES,
        ),
    )(p2d, t2d)

    num = jnp.sum(num_part) + tail_num
    den = jnp.sum(den_part) + tail_den
    # Same semantics as the PyTorch module (den == 0 -> NaN, like the reference).
    return 1.0 - num / den


if __name__ == "__main__":
    key = jax.random.PRNGKey(0)

    def ref_loss(outputs, targets, ignore_index=IGNORE_INDEX):
        t = targets.astype(jnp.float32)
        m = (t != ignore_index).astype(jnp.float32)
        num = jnp.sum(outputs * t * m)
        den = jnp.sum(outputs * m + t * m - outputs * t * m)
        return 1.0 - num / den

    def make_inputs(k, shape):
        k_out, k_tgt, k_ign = jax.random.split(k, 3)
        outputs = jax.nn.sigmoid(jax.random.normal(k_out, shape, jnp.float32))
        targets = jax.random.bernoulli(k_tgt, 0.5, shape).astype(jnp.int32)
        ignore_mask = jax.random.bernoulli(k_ign, 0.1, shape)
        targets = jnp.where(ignore_mask, IGNORE_INDEX, targets)
        return outputs, targets

    k1, k2, k3 = jax.random.split(key, 3)

    # 1) Main case: NCHW, lane-aligned (same convention as the PyTorch module).
    o, t = make_inputs(k1, (2, 4, 16, 16))
    loss = iou_loss(o, t)
    jax.block_until_ready(loss)
    ref = ref_loss(o, t)
    assert jnp.allclose(loss, ref, rtol=1e-5, atol=1e-5), (loss, ref)

    # 2) Ragged case (n % 128 != 0): exercises the wrapper-side tail path.
    o, t = make_inputs(k2, (3, 5, 7, 11))
    loss = iou_loss(o, t)
    jax.block_until_ready(loss)
    ref = ref_loss(o, t)
    assert jnp.allclose(loss, ref, rtol=1e-5, atol=1e-5), (loss, ref)

    # 3) Multi-block case with row overhang and a forced 2-way split: exercises
    #    the gated in-kernel tail mask and the replay-block skip at a tiny size.
    o, t = make_inputs(k3, (7, 371))
    loss = iou_loss(o, t, max_block_rows=8, num_splits=2)
    jax.block_until_ready(loss)
    ref = ref_loss(o, t)
    assert jnp.allclose(loss, ref, rtol=1e-5, atol=1e-5), (loss, ref)

    print("KERNEL_OK")
</pallas_src>

<mosaic_0001>
module attributes {stable_mosaic.version = 11 : i64} {
  func.func @_iou_loss_kernel(%arg0: i32, %arg1: i32, %arg2: memref<16x128xf32, #tpu.memory_space<vmem>>, %arg3: memref<16x128xi32, #tpu.memory_space<vmem>>, %arg4: memref<1x8x128xf32, #tpu.memory_space<vmem>>, %arg5: memref<1x8x128xf32, #tpu.memory_space<vmem>>) attributes {dimension_semantics = [#tpu.dimension_semantics<parallel>, #tpu.dimension_semantics<arbitrary>], iteration_bounds = array<i64: 1, 1>, scalar_prefetch = 0 : i64, scratch_operands = 0 : i64, tpu.core_type = #tpu.core_type<tc>, window_params = [{transform_indices = @transform_0, window_bounds = array<i64: 16, 128>}, {transform_indices = @transform_1, window_bounds = array<i64: 16, 128>}, {transform_indices = @transform_2, window_bounds = array<i64: 1, 8, 128>}, {transform_indices = @transform_3, window_bounds = array<i64: 1, 8, 128>}]} {
    %c0_i32 = arith.constant 0 : i32
    %0 = arith.cmpi eq, %arg1, %c0_i32 : i32
    %1 = arith.extui %0 : i1 to i32
    %c0_i32_0 = arith.constant 0 : i32
    %2 = arith.cmpi ne, %1, %c0_i32_0 : i32
    scf.if %2 {
      %cst_20 = arith.constant 0.000000e+00 : f32
      %27 = vector.broadcast %cst_20 : f32 to vector<1x8x128xf32>
      %c0_21 = arith.constant 0 : index
      %c0_22 = arith.constant 0 : index
      %c0_23 = arith.constant 0 : index
      %28 = vector.load %arg4[%c0_21, %c0_22, %c0_23] : memref<1x8x128xf32, #tpu.memory_space<vmem>>, vector<1x8x128xf32>
      tpu.vector_store %arg4[%c0_21, %c0_22, %c0_23], %27 {strides = array<i32>} : memref<1x8x128xf32, #tpu.memory_space<vmem>>, vector<1x8x128xf32>,
      %cst_24 = arith.constant 0.000000e+00 : f32
      %29 = vector.broadcast %cst_24 : f32 to vector<1x8x128xf32>
      %c0_25 = arith.constant 0 : index
      %c0_26 = arith.constant 0 : index
      %c0_27 = arith.constant 0 : index
      %30 = vector.load %arg5[%c0_25, %c0_26, %c0_27] : memref<1x8x128xf32, #tpu.memory_space<vmem>>, vector<1x8x128xf32>
      tpu.vector_store %arg5[%c0_25, %c0_26, %c0_27], %29 {strides = array<i32>} : memref<1x8x128xf32, #tpu.memory_space<vmem>>, vector<1x8x128xf32>,
    } else {
    }
    %c0 = arith.constant 0 : index
    %c0_1 = arith.constant 0 : index
    %3 = vector.load %arg2[%c0, %c0_1] : memref<16x128xf32, #tpu.memory_space<vmem>>, vector<16x128xf32>
    %c0_2 = arith.constant 0 : index
    %c0_3 = arith.constant 0 : index
    %4 = vector.load %arg3[%c0_2, %c0_3] : memref<16x128xi32, #tpu.memory_space<vmem>>, vector<16x128xi32>
    %5 = arith.sitofp %4 : vector<16x128xi32> to vector<16x128xf32>
    %cst = arith.constant 2.550000e+02 : f32
    %6 = vector.broadcast %cst : f32 to vector<16x128xf32>
    %7 = arith.cmpf one, %5, %6 : vector<16x128xf32>
    %8 = arith.mulf %3, %5 : vector<16x128xf32>
    %cst_4 = arith.constant 0.000000e+00 : f32
    %9 = vector.broadcast %cst_4 : f32 to vector<16x128xf32>
    %10 = arith.select %7, %8, %9 : vector<16x128xi1>, vector<16x128xf32>
    %11 = arith.addf %3, %5 : vector<16x128xf32>
    %cst_5 = arith.constant 0.000000e+00 : f32
    %12 = vector.broadcast %cst_5 : f32 to vector<16x128xf32>
    %13 = arith.select %7, %11, %12 : vector<16x128xi1>, vector<16x128xf32>
    %14 = arith.subf %13, %10 : vector<16x128xf32>
    %c0_6 = arith.constant 0 : index
    %c0_7 = arith.constant 0 : index
    %c0_8 = arith.constant 0 : index
    %15 = vector.load %arg4[%c0_6, %c0_7, %c0_8] : memref<1x8x128xf32, #tpu.memory_space<vmem>>, vector<1x8x128xf32>
    %16 = vector.shape_cast %10 : vector<16x128xf32> to vector<2x8x128xf32>
    %cst_9 = arith.constant dense<0.000000e+00> : vector<8x128xf32>
    %17 = vector.multi_reduction <add>, %16, %cst_9 [0] : vector<2x8x128xf32> to vector<8x128xf32>
    %18 = vector.shape_cast %17 : vector<8x128xf32> to vector<1x8x128xf32>
    %19 = arith.addf %15, %18 : vector<1x8x128xf32>
    %c0_10 = arith.constant 0 : index
    %c0_11 = arith.constant 0 : index
    %c0_12 = arith.constant 0 : index
    %20 = vector.load %arg4[%c0_10, %c0_11, %c0_12] : memref<1x8x128xf32, #tpu.memory_space<vmem>>, vector<1x8x128xf32>
    tpu.vector_store %arg4[%c0_10, %c0_11, %c0_12], %19 {strides = array<i32>} : memref<1x8x128xf32, #tpu.memory_space<vmem>>, vector<1x8x128xf32>,
    %c0_13 = arith.constant 0 : index
    %c0_14 = arith.constant 0 : index
    %c0_15 = arith.constant 0 : index
    %21 = vector.load %arg5[%c0_13, %c0_14, %c0_15] : memref<1x8x128xf32, #tpu.memory_space<vmem>>, vector<1x8x128xf32>
    %22 = vector.shape_cast %14 : vector<16x128xf32> to vector<2x8x128xf32>
    %cst_16 = arith.constant dense<0.000000e+00> : vector<8x128xf32>
    %23 = vector.multi_reduction <add>, %22, %cst_16 [0] : vector<2x8x128xf32> to vector<8x128xf32>
    %24 = vector.shape_cast %23 : vector<8x128xf32> to vector<1x8x128xf32>
    %25 = arith.addf %21, %24 : vector<1x8x128xf32>
    %c0_17 = arith.constant 0 : index
    %c0_18 = arith.constant 0 : index
    %c0_19 = arith.constant 0 : index
    %26 = vector.load %arg5[%c0_17, %c0_18, %c0_19] : memref<1x8x128xf32, #tpu.memory_space<vmem>>, vector<1x8x128xf32>
    tpu.vector_store %arg5[%c0_17, %c0_18, %c0_19], %25 {strides = array<i32>} : memref<1x8x128xf32, #tpu.memory_space<vmem>>, vector<1x8x128xf32>,
    return
  }
  func.func @transform_0(%arg0: i32, %arg1: i32) -> (i32, i32) {
    %c1_i32 = arith.constant 1 : i32
    %0 = arith.muli %arg0, %c1_i32 : i32
    %1 = arith.addi %0, %arg1 : i32
    %c0_i32 = arith.constant 0 : i32
    %2 = arith.minsi %1, %c0_i32 : i32
    %c0_i32_0 = arith.constant 0 : i32
    %c0_i32_1 = arith.constant 0 : i32
    return %2, %c0_i32_0 : i32, i32
  }
  func.func @transform_1(%arg0: i32, %arg1: i32) -> (i32, i32) {
    %c1_i32 = arith.constant 1 : i32
    %0 = arith.muli %arg0, %c1_i32 : i32
    %1 = arith.addi %0, %arg1 : i32
    %c0_i32 = arith.constant 0 : i32
    %2 = arith.minsi %1, %c0_i32 : i32
    %c0_i32_0 = arith.constant 0 : i32
    %c0_i32_1 = arith.constant 0 : i32
    return %2, %c0_i32_0 : i32, i32
  }
  func.func @transform_2(%arg0: i32, %arg1: i32) -> (i32, i32, i32) {
    %c0_i32 = arith.constant 0 : i32
    %c0_i32_0 = arith.constant 0 : i32
    %c0_i32_1 = arith.constant 0 : i32
    return %arg0, %c0_i32, %c0_i32_0 : i32, i32, i32
  }
  func.func @transform_3(%arg0: i32, %arg1: i32) -> (i32, i32, i32) {
    %c0_i32 = arith.constant 0 : i32
    %c0_i32_0 = arith.constant 0 : i32
    %c0_i32_1 = arith.constant 0 : i32
    return %arg0, %c0_i32, %c0_i32_0 : i32, i32, i32
  }
}

</mosaic_0001>

<bundles_post_ra>
// kernel: tpu_custom_call.1
= control target key start
LH: loop header
LB: loop body
LE: loop exit
PB: predicated region body
PF: predicated region fallthrough
CT: control target
= control target key end

     0   :  { %9 = vsyncpa [#allocation3], 0  ;;  %s306_s0 = inlined_call_operand.hbm [shape: f32[16,128], index: 0, kind: input, shape index: {}]   ;;  %s307_s1 = inlined_call_operand.hbm [shape: s32[16,128], index: 1, kind: input, shape index: {}]   ;;  %s308_s2 = inlined_call_operand.hbm [shape: f32[1,8,128], index: 2, kind: output, shape index: {0}]   ;;  %s309_s3 = inlined_call_operand.hbm [shape: f32[1,8,128], index: 3, kind: output, shape index: {1}]  }
   0x1   :  { %10 = vsyncpa [#allocation6], 0 }
   0x2   :  { %11 = vsyncpa [#allocation4], 0 }
   0x3   :  { %12 = vsyncpa [#allocation9], 0  ;;  %s232_s12 = smov [#allocation2]   ;;  %s136_s16 = scalar_lea.hbm %s306_s0, 256 }
   0x4   :  { %s24_s13 = sshll.u32 %s232_s12, 4  ;;  %p137_p0 = scmp.ne.s32.totalorder %s306_s0, %s136_s16  ;;  %s25_s13 = int_to_ptr.vmem [resolvable:$true] %s24_s13 }
   0x5   :  { %p140_p1 = scmp.lt.u32.totalorder %s136_s16, %s306_s0 }
   0x7   :  { %p142_p2 = pnand %p140_p1, %p137_p0 }
   0x9   :  { %145 = shalt.err (!%p142_p2)
}
   0xa   :  { %s146_s21 = scalar_lea.vmem %s25_s13, 256  ;;  %p151_p4 = scmp.lt.s32.totalorder %s25_s13, %s25_s13 }
   0xb   :  { %p147_p3 = scmp.ne.s32.totalorder %s25_s13, %s146_s21  ;;  %p152_p5 = scmp.lt.s32.totalorder %s146_s21, %s146_s21 }
   0xd   :  { %p153_p6 = por %p152_p5, %p151_p4 }
   0xf   :  { %p154_p7 = pnand %p153_p6, %p147_p3 }
  0x11   :  { %157 = shalt.err (!%p154_p7)
}
  0x12   :  { %s233_s22 = smov 128   ;;  %s234_s23 = smov 8  }
  0x13   :  { %30 = dma.hbm_to_vmem [thread:$0]  %s306_s0, 256, %s25_s13, [#allocation3], %s233_s22, %s233_s22, %s234_s23  }
  0x14   :  { %s235_s26 = smov [#allocation5]   ;;  %s158_s30 = scalar_lea.hbm %s307_s1, 256 }
  0x15   :  { %s42_s27 = sshll.u32 %s235_s26, 4  ;;  %p159_p8 = scmp.ne.s32.totalorder %s307_s1, %s158_s30  ;;  %s43_s27 = int_to_ptr.vmem [resolvable:$true] %s42_s27 }
  0x16   :  { %p162_p9 = scmp.lt.u32.totalorder %s158_s30, %s307_s1 }
  0x18   :  { %p164_p10 = pnand %p162_p9, %p159_p8 }
  0x1a   :  { %167 = shalt.err (!%p164_p10)
}
  0x1b   :  { %s168_s8 = scalar_lea.vmem %s43_s27, 256  ;;  %p173_p12 = scmp.lt.s32.totalorder %s43_s27, %s43_s27 }
  0x1c   :  { %p169_p11 = scmp.ne.s32.totalorder %s43_s27, %s168_s8  ;;  %p174_p13 = scmp.lt.s32.totalorder %s168_s8, %s168_s8 }
  0x1e   :  { %p175_p0 = por %p174_p13, %p173_p12 }
  0x20   :  { %p176_p1 = pnand %p175_p0, %p169_p11 }
  0x22   :  { %179 = shalt.err (!%p176_p1)
}
  0x23   :  { %48 = dma.hbm_to_vmem [thread:$0]  %s307_s1, 256, %s43_s27, [#allocation6], %s233_s22, %s233_s22, %s234_s23  }
  0x24   :  { %224 = dma.done.wait [#allocation3], 256  }
  0x25   :  { %225 = vsyncadd [#allocation3], 4294967040 }
  0x26   :  { %226 = dma.done.wait [#allocation6], 256  }
  0x27   :  { %227 = vsyncadd [#allocation6], 4294967040  ;;  %v69_v0 = vld [vmem:[#allocation2] sm:$0xff]  ;;  %v71_v1 = vld [vmem:[#allocation5] sm:$0xff]  ;;  %s236_s1 = smov [#allocation7]   ;;  %s237_s11 = smov [#allocation8]  }
  0x28   :  { %v70_v2 = vld [vmem:[#allocation2 + $0x8] sm:$0xff]  ;;  %v72_v3 = vld [vmem:[#allocation5 + $0x8] sm:$0xff]  ;;  %v73_v4 = vcvt.s32.f32 %v71_v1  ;;  %s101_s10 = sshll.u32 %s236_s1, 4  ;;  %s111_s12 = sshll.u32 %s237_s11, 4  ;;  %s102_s10 = int_to_ptr.vmem [resolvable:$true] %s101_s10  ;;  %s112_s12 = int_to_ptr.vmem [resolvable:$true] %s111_s12 }
  0x29   :  { %v74_v5 = vcvt.s32.f32 %v72_v3  ;;  %s180_s13 = scalar_lea.vmem %s102_s10, 128  ;;  %p185_p3 = scmp.lt.s32.totalorder %s102_s10, %s102_s10 }
  0x2a   :  { %vm75_vm0 = vcmp.ne.f32.partialorder %v73_v4, 255.0  ;;  %v77_v6 = vmul.f32 %v73_v4, %v69_v0  ;;  %v81_v7 = vadd.f32 %v73_v4, %v69_v0  ;;  %p181_p2 = scmp.ne.s32.totalorder %s102_s10, %s180_s13  ;;  %p186_p4 = scmp.lt.s32.totalorder %s180_s13, %s180_s13 }
  0x2b   :  { %vm76_vm1 = vcmp.ne.f32.partialorder %v74_v5, 255.0  ;;  %v78_v8 = vmul.f32 %v74_v5, %v70_v2  ;;  %v82_v9 = vadd.f32 %v74_v5, %v70_v2 }
  0x2c   :  { %v79_v10 = vsel %vm75_vm0, %v77_v6, 0.0  ;;  %v83_v11 = vsel %vm75_vm0, %v81_v7, 0.0  ;;  %p187_p5 = por %p186_p4, %p185_p3 }
  0x2d   :  { %v80_v12 = vsel %vm76_vm1, %v78_v8, 0.0  ;;  %v84_v13 = vsel %vm76_vm1, %v82_v9, 0.0  ;;  %v85_v14 = vsub.f32 %v83_v11, %v79_v10 }
  0x2e   :  { %v88_v15 = vadd.f32 %v80_v12, %v79_v10  ;;  %v86_v16 = vsub.f32 %v84_v13, %v80_v12  ;;  %p188_p6 = pnand %p187_p5, %p181_p2 }
  0x30   :  { %v92_v17 = vadd.f32 %v86_v16, %v85_v14  ;;  %90 = vst [vmem:[#allocation7] sm:$0xff] %v88_v15 }
  0x31   :  { %191 = shalt.err (!%p188_p6)
}
  0x32   :  { %s192_s16 = scalar_lea.hbm %s308_s2, 128 }
  0x33   :  { %p193_p7 = scmp.ne.s32.totalorder %s308_s2, %s192_s16  ;;  %p196_p8 = scmp.lt.u32.totalorder %s192_s16, %s308_s2 }
  0x35   :  { %p198_p9 = pnand %p196_p8, %p193_p7 }
  0x37   :  { %201 = shalt.err (!%p198_p9)
}
  0x38   :  { %104 = dma.vmem_to_hbm [thread:$0]  %s102_s10, 128, %s308_s2, [#allocation4]   ;;  %94 = vst [vmem:[#allocation8] sm:$0xff] %v92_v17 }
  0x39   :  { %s202_s23 = scalar_lea.vmem %s112_s12, 128  ;;  %p207_p11 = scmp.lt.s32.totalorder %s112_s12, %s112_s12 }
  0x3a   :  { %p203_p10 = scmp.ne.s32.totalorder %s112_s12, %s202_s23  ;;  %p208_p12 = scmp.lt.s32.totalorder %s202_s23, %s202_s23 }
  0x3c   :  { %p209_p13 = por %p208_p12, %p207_p11 }
  0x3e   :  { %p210_p0 = pnand %p209_p13, %p203_p10 }
  0x40   :  { %213 = shalt.err (!%p210_p0)
}
  0x41   :  { %s214_s26 = scalar_lea.hbm %s309_s3, 128 }
  0x42   :  { %p215_p1 = scmp.ne.s32.totalorder %s309_s3, %s214_s26  ;;  %p218_p2 = scmp.lt.u32.totalorder %s214_s26, %s309_s3 }
  0x44   :  { %p220_p3 = pnand %p218_p2, %p215_p1 }
  0x46   :  { %223 = shalt.err (!%p220_p3)
}
  0x47   :  { %114 = dma.vmem_to_hbm [thread:$0]  %s112_s12, 128, %s309_s3, [#allocation9]  }
  0x48   :  { %228 = dma.done.wait [#allocation4], 128  }
  0x49   :  { %229 = vsyncadd [#allocation4], 4294967168 }
  0x4a   :  { %230 = dma.done.wait [#allocation9], 128  }
  0x4b   :  { %231 = vsyncadd [#allocation9], 4294967168 }
  0x4c   :  { %121 = vsyncpa [#allocation3], 1 }
  0x4d   :  { %122 = vsyncpa [#allocation6], 1 }
  0x4e   :  { %123 = vsyncpa [#allocation4], 1 }
  0x4f   :  { %124 = vsyncpa [#allocation9], 1 }

</bundles_post_ra>
